<compile_context>
chip_gen: v7x
topology: tpu7x:2x2x1
jax: 0.10.0
libtpu: 0.0.40
codegen_flags: <defaults>
</compile_context>

<pallas_src>
import jax
import jax.numpy as jnp
from jax.experimental import pallas as pl
from jax.experimental.pallas import tpu as pltpu


def _d2rl_fused_kernel(x_ref, w_ref, b_ref, h2_ref):
    """Fused actor+critic D2RL forward.

    x_ref : (B, F)        features (already cast to the compute dtype)
    w_ref : (2F+2H, 2H)   packed weights  [W1cat ; W2x_cat ; W2h_blockdiag]
    b_ref : (2, 2H)       packed biases   [b1cat ; b2cat]   (float32)
    h2_ref: (B, 2H)       output slab     [h2_policy | h2_value]  (float32)
    """
    F = x_ref.shape[1]
    x = x_ref[...]                       # (B, F), compute dtype

    w1 = w_ref[0:F, :]                   # (F, 2H)   [W1p | W1v]
    w2x = w_ref[F:2 * F, :]              # (F, 2H)   [W2p[:F] | W2v[:F]]
    w2h = w_ref[2 * F:, :]               # (2H, 2H)  blockdiag(W2p[F:], W2v[F:])
    b1 = b_ref[0:1, :]                   # (1, 2H)   f32
    b2 = b_ref[1:2, :]                   # (1, 2H)   f32

    # Layer 1, both branches in one 128-lane matmul: h1 = tanh(x @ W1cat + b1)
    h1 = jnp.tanh(jnp.dot(x, w1, preferred_element_type=jnp.float32) + b1)

    # Layer 2 with the skip-concat rewritten as a split matmul (exact algebra):
    #   tanh([x, h1] @ W2 + b2) == tanh(x @ W2x + h1 @ W2h + b2)
    h2 = jnp.tanh(
        jnp.dot(x, w2x, preferred_element_type=jnp.float32)
        + jnp.dot(h1.astype(w_ref.dtype), w2h, preferred_element_type=jnp.float32)
        + b2)

    h2_ref[...] = h2.astype(h2_ref.dtype)


def pack_params(params, *, compute_dtype=jnp.float32):
    """Pack the 8 Linear params into one weight slab + one bias slab (done once)."""
    F, H = params["w1p"].shape
    zeros = jnp.zeros((H, H), jnp.float32)

    w1cat = jnp.concatenate([params["w1p"], params["w1v"]], axis=1)             # (F, 2H)
    w2x_cat = jnp.concatenate([params["w2p"][:F], params["w2v"][:F]], axis=1)   # (F, 2H)
    w2h_blk = jnp.concatenate(
        [jnp.concatenate([params["w2p"][F:], zeros], axis=1),
         jnp.concatenate([zeros, params["w2v"][F:]], axis=1)], axis=0)          # (2H, 2H)
    w_slab = jnp.concatenate([w1cat, w2x_cat, w2h_blk], axis=0).astype(compute_dtype)

    b_slab = jnp.concatenate(
        [jnp.concatenate([params["b1p"], params["b1v"]], axis=1),
         jnp.concatenate([params["b2p"], params["b2v"]], axis=1)], axis=0
    ).astype(jnp.float32)                                                        # biases stay f32
    return w_slab, b_slab


def d2rl_forward(features, w_slab, b_slab, hidden_dim):
    """features: (B, F) f32; w_slab/b_slab from pack_params. Returns (actor, critic)."""
    B, F = features.shape
    two_h = 2 * hidden_dim
    x = features.astype(w_slab.dtype)    # bf16 on v6e/v7x if packed as bf16

    vmem = pl.BlockSpec(memory_space=pltpu.MemorySpace.VMEM)
    h2 = pl.pallas_call(
        _d2rl_fused_kernel,
        out_shape=jax.ShapeDtypeStruct((B, two_h), jnp.float32),
        in_specs=[vmem, vmem, vmem],
        out_specs=vmem,
    )(x, w_slab, b_slab)

    # Final skip-concats done outside the kernel: keeps the kernel's output a
    # lane-dense 128-wide slab and avoids copying the features through VMEM.
    actor = jnp.concatenate([features, h2[:, :hidden_dim]], axis=-1)
    critic = jnp.concatenate([features, h2[:, hidden_dim:]], axis=-1)
    return actor, critic


def init_params(key, feature_dim, hidden_dim):
    """Deterministic synthetic parameter init (shapes match the nn.Linear layers)."""
    ks = jax.random.split(key, 8)
    scale1 = 1.0 / jnp.sqrt(jnp.float32(feature_dim))
    scale2 = 1.0 / jnp.sqrt(jnp.float32(feature_dim + hidden_dim))
    return {
        "w1p": jax.random.uniform(ks[0], (feature_dim, hidden_dim),
                                  jnp.float32, -scale1, scale1),
        "b1p": jax.random.uniform(ks[1], (1, hidden_dim),
                                  jnp.float32, -scale1, scale1),
        "w2p": jax.random.uniform(ks[2], (feature_dim + hidden_dim, hidden_dim),
                                  jnp.float32, -scale2, scale2),
        "b2p": jax.random.uniform(ks[3], (1, hidden_dim),
                                  jnp.float32, -scale2, scale2),
        "w1v": jax.random.uniform(ks[4], (feature_dim, hidden_dim),
                                  jnp.float32, -scale1, scale1),
        "b1v": jax.random.uniform(ks[5], (1, hidden_dim),
                                  jnp.float32, -scale1, scale1),
        "w2v": jax.random.uniform(ks[6], (feature_dim + hidden_dim, hidden_dim),
                                  jnp.float32, -scale2, scale2),
        "b2v": jax.random.uniform(ks[7], (1, hidden_dim),
                                  jnp.float32, -scale2, scale2),
    }


def reference_forward(features, params):
    """Pure-JAX reference of D2RLNet.forward for verification."""
    def branch(w1, b1, w2, b2):
        h1 = jnp.tanh(features @ w1 + b1)
        cat1 = jnp.concatenate([features, h1], axis=-1)
        h2 = jnp.tanh(cat1 @ w2 + b2)
        return jnp.concatenate([features, h2], axis=-1)
    actor = branch(params["w1p"], params["b1p"], params["w2p"], params["b2p"])
    critic = branch(params["w1v"], params["b1v"], params["w2v"], params["b2v"])
    return actor, critic


if __name__ == "__main__":
    B, FEATURE_DIM, HIDDEN_DIM = 8, 32, 64

    key = jax.random.PRNGKey(0)
    k_x, k_p = jax.random.split(key)
    features = jax.random.normal(k_x, (B, FEATURE_DIM), jnp.float32)
    params = init_params(k_p, FEATURE_DIM, HIDDEN_DIM)
    ref_actor, ref_critic = reference_forward(features, params)

    fwd = jax.jit(d2rl_forward, static_argnums=3)

    # --- f32 path (default): exact match with the reference ---
    w_slab, b_slab = pack_params(params, compute_dtype=jnp.float32)
    actor, critic = fwd(features, w_slab, b_slab, HIDDEN_DIM)
    actor = jax.block_until_ready(actor)
    critic = jax.block_until_ready(critic)

    assert actor.shape == (B, FEATURE_DIM + HIDDEN_DIM)
    assert critic.shape == (B, FEATURE_DIM + HIDDEN_DIM)
    assert jnp.allclose(actor, ref_actor, atol=1e-5, rtol=1e-5)
    assert jnp.allclose(critic, ref_critic, atol=1e-5, rtol=1e-5)

    # --- bf16 weight/activation path (v6e/v7x MXU-native), f32 accumulation ---
    w_slab_bf, b_slab_bf = pack_params(params, compute_dtype=jnp.bfloat16)
    actor_bf, critic_bf = fwd(features, w_slab_bf, b_slab_bf, HIDDEN_DIM)
    actor_bf = jax.block_until_ready(actor_bf)
    critic_bf = jax.block_until_ready(critic_bf)
    assert jnp.allclose(actor_bf, ref_actor, atol=3e-2, rtol=3e-2)
    assert jnp.allclose(critic_bf, ref_critic, atol=3e-2, rtol=3e-2)

    print("KERNEL_OK")
</pallas_src>

<mosaic_0001>
module attributes {stable_mosaic.version = 11 : i64} {
  func.func @_d2rl_fused_kernel(%arg0: memref<8x32xf32, #tpu.memory_space<vmem>>, %arg1: memref<192x128xf32, #tpu.memory_space<vmem>>, %arg2: memref<2x128xf32, #tpu.memory_space<vmem>>, %arg3: memref<8x128xf32, #tpu.memory_space<vmem>>) attributes {dimension_semantics = [], scalar_prefetch = 0 : i64, scratch_operands = 0 : i64, tpu.core_type = #tpu.core_type<tc>} {
    %c0 = arith.constant 0 : index
    %c0_0 = arith.constant 0 : index
    %0 = vector.load %arg0[%c0, %c0_0] : memref<8x32xf32, #tpu.memory_space<vmem>>, vector<8x32xf32>
    %c0_1 = arith.constant 0 : index
    %c0_2 = arith.constant 0 : index
    %1 = vector.load %arg1[%c0_1, %c0_2] : memref<192x128xf32, #tpu.memory_space<vmem>>, vector<32x128xf32>
    %c32 = arith.constant 32 : index
    %c0_3 = arith.constant 0 : index
    %2 = vector.load %arg1[%c32, %c0_3] : memref<192x128xf32, #tpu.memory_space<vmem>>, vector<32x128xf32>
    %c64 = arith.constant 64 : index
    %c0_4 = arith.constant 0 : index
    %3 = vector.load %arg1[%c64, %c0_4] : memref<192x128xf32, #tpu.memory_space<vmem>>, vector<128x128xf32>
    %c0_5 = arith.constant 0 : index
    %c0_6 = arith.constant 0 : index
    %4 = vector.load %arg2[%c0_5, %c0_6] : memref<2x128xf32, #tpu.memory_space<vmem>>, vector<1x128xf32>
    %c1 = arith.constant 1 : index
    %c0_7 = arith.constant 0 : index
    %5 = vector.load %arg2[%c1, %c0_7] : memref<2x128xf32, #tpu.memory_space<vmem>>, vector<1x128xf32>
    %cst = arith.constant dense<0.000000e+00> : vector<8x128xf32>
    %6 = tpu.matmul %0, %1, %cst {dimension_numbers = #tpu.dot_dimension_numbers<[1], [0], [0], [1], [0, 0, 1, 1], [], []>} : vector<8x32xf32>, vector<32x128xf32>, vector<8x128xf32> -> vector<8x128xf32>
    %7 = vector.broadcast %4 : vector<1x128xf32> to vector<8x128xf32>
    %8 = arith.addf %6, %7 : vector<8x128xf32>
    %9 = math.tanh %8 : vector<8x128xf32>
    %cst_8 = arith.constant dense<0.000000e+00> : vector<8x128xf32>
    %10 = tpu.matmul %0, %2, %cst_8 {dimension_numbers = #tpu.dot_dimension_numbers<[1], [0], [0], [1], [0, 0, 1, 1], [], []>} : vector<8x32xf32>, vector<32x128xf32>, vector<8x128xf32> -> vector<8x128xf32>
    %cst_9 = arith.constant dense<0.000000e+00> : vector<8x128xf32>
    %11 = tpu.matmul %9, %3, %cst_9 {dimension_numbers = #tpu.dot_dimension_numbers<[1], [0], [0], [1], [0, 0, 1, 1], [], []>} : vector<8x128xf32>, vector<128x128xf32>, vector<8x128xf32> -> vector<8x128xf32>
    %12 = arith.addf %10, %11 : vector<8x128xf32>
    %13 = vector.broadcast %5 : vector<1x128xf32> to vector<8x128xf32>
    %14 = arith.addf %12, %13 : vector<8x128xf32>
    %15 = math.tanh %14 : vector<8x128xf32>
    %c0_10 = arith.constant 0 : index
    %c0_11 = arith.constant 0 : index
    %16 = vector.load %arg3[%c0_10, %c0_11] : memref<8x128xf32, #tpu.memory_space<vmem>>, vector<8x128xf32>
    tpu.vector_store %arg3[%c0_10, %c0_11], %15 {strides = array<i32>} : memref<8x128xf32, #tpu.memory_space<vmem>>, vector<8x128xf32>,
    return
  }
}

</mosaic_0001>

<bundles_post_ra>
// kernel: d2rl_forward.1
= control target key start
LH: loop header
LB: loop body
LE: loop exit
PB: predicated region body
PF: predicated region fallthrough
CT: control target
= control target key end

     0   :  { %8 = vsyncpa [#allocation3], 0  ;;  %s566_s0 = inlined_call_operand.hbm [shape: f32[8,32], index: 0, kind: input, shape index: {}]   ;;  %s567_s1 = inlined_call_operand.hbm [shape: f32[192,128], index: 1, kind: input, shape index: {}]   ;;  %s568_s2 = inlined_call_operand.vmem [shape: f32[2,128], index: 2, kind: input, shape index: {}]   ;;  %s569_s3 = inlined_call_operand.vmem [shape: f32[8,128], index: 3, kind: output, shape index: {}]  }
   0x1   :  { %9 = vsyncpa [#allocation5], 0  ;;  %s482_s12 = smov [#allocation2]   ;;  %s483_s14 = smov [#allocation4]  }
   0x2   :  { %s16_s13 = sshll.u32 %s482_s12, 4  ;;  %s25_s15 = sshll.u32 %s483_s14, 4  ;;  %s17_s13 = int_to_ptr.vmem [resolvable:$true] %s16_s13  ;;  %s509_s15 = int_to_ptr.vmem [resolvable:$true] %s25_s15 }
   0x3   :  { %s434_s18 = scalar_lea.hbm %s566_s0, 128 }
   0x4   :  { %p435_p0 = scmp.ne.s32.totalorder %s566_s0, %s434_s18  ;;  %p438_p1 = scmp.lt.u32.totalorder %s434_s18, %s566_s0 }
   0x6   :  { %p440_p2 = pnand %p438_p1, %p435_p0 }
   0x8   :  { %443 = shalt.err (!%p440_p2)
}
   0x9   :  { %s444_s23 = scalar_lea.vmem %s17_s13, 128  ;;  %p449_p4 = scmp.lt.s32.totalorder %s17_s13, %s17_s13 }
   0xa   :  { %p445_p3 = scmp.ne.s32.totalorder %s17_s13, %s444_s23  ;;  %p450_p5 = scmp.lt.s32.totalorder %s444_s23, %s444_s23 }
   0xc   :  { %p451_p6 = por %p450_p5, %p449_p4 }
   0xe   :  { %p452_p7 = pnand %p451_p6, %p445_p3 }
  0x10   :  { %455 = shalt.err (!%p452_p7)
}
  0x11   :  { %19 = dma.hbm_to_vmem [thread:$0]  %s566_s0, 128, %s17_s13, [#allocation3]  }
  0x12   :  { %s456_s28 = scalar_lea.hbm %s567_s1, 3072 }
  0x13   :  { %p457_p8 = scmp.ne.s32.totalorder %s567_s1, %s456_s28  ;;  %p460_p9 = scmp.lt.u32.totalorder %s456_s28, %s567_s1 }
  0x15   :  { %p462_p10 = pnand %p460_p9, %p457_p8 }
  0x17   :  { %465 = shalt.err (!%p462_p10)
}
  0x18   :  { %s466_s6 = scalar_lea.vmem %s509_s15, 3072  ;;  %p471_p12 = scmp.lt.s32.totalorder %s509_s15, %s509_s15 }
  0x19   :  { %p467_p11 = scmp.ne.s32.totalorder %s509_s15, %s466_s6  ;;  %p472_p13 = scmp.lt.s32.totalorder %s466_s6, %s466_s6 }
  0x1b   :  { %p473_p0 = por %p472_p13, %p471_p12 }
  0x1d   :  { %p474_p1 = pnand %p473_p0, %p467_p11 }
  0x1f   :  { %477 = shalt.err (!%p474_p1)
}
  0x20   :  { %s484_s0 = smov 128   ;;  %s485_s7 = smov 8  }
  0x21   :  { %31 = dma.hbm_to_vmem [thread:$0]  %s567_s1, 3072, %s509_s15, [#allocation5], %s484_s0, %s484_s0, %s485_s7  }
  0x22   :  { %478 = dma.done.wait [#allocation3], 128  }
  0x23   :  { %479 = vsyncadd [#allocation3], 4294967168 }
  0x24   :  { %480 = dma.done.wait [#allocation5], 3072  }
  0x25   :  { %481 = vsyncadd [#allocation5], 4294964224  ;;  %v486_v0 = vmov 0.0|0.0   ;;  %vm487_vm0 = vmmov 0   ;;  %v488_v1 = vmov 0.0   ;;  %v41_v2 = vld [vmem:[#allocation4] sm:$0xff] }
  0x26   :  { %387 = vmatprep.subr.bf16.mxu0 %v486_v0  ;;  %338 = vmatprep.mubr.msk.f32.mxu0 %vm487_vm0, %v488_v1  ;;  %v42_v3 = vld [vmem:[#allocation4 + $0x8] sm:$0xff]  ;;  %v43_v4 = vld [vmem:[#allocation4 + $0x10] sm:$0xff]  ;;  %v44_v6 = vld [vmem:[#allocation4 + $0x18] sm:$0xff]  ;;  %vm71_vm1 = vcmask 261120  }
  0x27   :  { %393 = vmatprep.subr.bf16.mxu1 %v486_v0  ;;  %373 = vmatprep.mubr.msk.f32.mxu1 %vm487_vm0, %v488_v1  ;;  %v388_v5 = vpack.c.bf16 %v42_v3, %v41_v2  ;;  %v49_v7 = vld [vmem:[#allocation4 + $0x40] sm:$0xff]  ;;  %v50_v8 = vld [vmem:[#allocation4 + $0x48] sm:$0xff]  ;;  %v51_v9 = vld [vmem:[#allocation4 + $0x50] sm:$0xff]  ;;  %v391_v11 = vpack.c.bf16 %v44_v6, %v43_v4 }
  0x28   :  { %v52_v10 = vld [vmem:[#allocation4 + $0x58] sm:$0xff]  ;;  %v394_v12 = vpack.c.bf16 %v50_v8, %v49_v7  ;;  %v53_v14 = vld [vmem:[#allocation4 + $0x60] sm:$0xff]  ;;  %v54_v15 = vld [vmem:[#allocation4 + $0x68] sm:$0xff] }
  0x29   :  { %389 = vmatpush3.bf16.msra.mxu0 %v388_v5  ;;  %v397_v13 = vpack.c.bf16 %v52_v10, %v51_v9  ;;  %v40_v16 = vld [vmem:[#allocation2] sm:$0xff]  ;;  %v400_v17 = vpack.c.bf16 %v54_v15, %v53_v14  ;;  %v55_v18 = vld [vmem:[#allocation4 + $0x70] sm:$0xff]  ;;  %v57_v21 = vld [vmem:[#allocation4 + $0x80] sm:$0xff] }
  0x2a   :  { %390 = vmatprep.subr.bf16.mxu0 %v486_v0  ;;  %395 = vmatpush3.bf16.msra.mxu1 %v394_v12  ;;  %v56_v19 = vld [vmem:[#allocation4 + $0x78] sm:$0xff]  ;;  %v58_v22 = vld [vmem:[#allocation4 + $0x88] sm:$0xff]  ;;  %v59_v24 = vld [vmem:[#allocation4 + $0x90] sm:$0xff] }
  0x2b   :  { %396 = vmatprep.subr.bf16.mxu1 %v486_v0  ;;  %v403_v20 = vpack.c.bf16 %v56_v19, %v55_v18  ;;  %v406_v23 = vpack.c.bf16 %v58_v22, %v57_v21  ;;  %v60_v25 = vld [vmem:[#allocation4 + $0x98] sm:$0xff]  ;;  %v45_v27 = vld [vmem:[#allocation4 + $0x20] sm:$0xff]  ;;  %v46_v28 = vld [vmem:[#allocation4 + $0x28] sm:$0xff] }
  0x2c   :  { %v409_v26 = vpack.c.bf16 %v60_v25, %v59_v24  ;;  %v61_v29 = vld [vmem:[#allocation4 + $0xa0] sm:$0xff]  ;;  %v418_v30 = vpack.c.bf16 %v46_v28, %v45_v27  ;;  %v62_v31 = vld [vmem:[#allocation4 + $0xa8] sm:$0xff]  ;;  %v47_v32 = vld [vmem:[#allocation4 + $0x30] sm:$0xff] }
  0x2d   :  { %392 = vmatpush3.bf16.msra.mxu0 %v391_v11  ;;  %v48_v33 = vld [vmem:[#allocation4 + $0x38] sm:$0xff]  ;;  %v412_v34 = vpack.c.bf16 %v62_v31, %v61_v29  ;;  %v63_v35 = vld [vmem:[#allocation4 + $0xb0] sm:$0xff] }
  0x2e   :  { %417 = vmatprep.subr.bf16.mxu0 %v486_v0  ;;  %398 = vmatpush3.bf16.msra.mxu1 %v397_v13  ;;  %v64_v36 = vld [vmem:[#allocation4 + $0xb8] sm:$0xff]  ;;  %v421_v37 = vpack.c.bf16 %v48_v33, %v47_v32 }
  0x2f   :  { %399 = vmatprep.subr.bf16.mxu1 %v486_v0  ;;  %v415_v38 = vpack.c.bf16 %v64_v36, %v63_v35  ;;  %v299_v39 = vld [vmem:[%s568_s2] ss:$0 sm:$0xff]  ;;  %v302_v46 = vld [vmem:[%s568_s2 + $0x1] ss:$0 sm:$0xff] }
  0x30   :  { %339 = vmatmul.mubr.msk.f32.vlgmr.msra.gmra.mrb[0].mxu0 %vm71_vm1, %v40_v16 }
  0x31   :  { %384 = vmatprep.mubr.msk.f32.mxu0 %vm487_vm0, %v488_v1  ;;  %419 = vmatpush3.bf16.msra.mxu0 %v418_v30 }
  0x32   :  { %401 = vmatpush3.bf16.msra.mxu1 %v400_v17  ;;  %420 = vmatprep.subr.bf16.mxu0 %v486_v0 }
  0x33   :  { %402 = vmatprep.subr.bf16.mxu1 %v486_v0 }
  0x35   :  { %422 = vmatpush3.bf16.msra.mxu0 %v421_v37 }
  0x36   :  { %404 = vmatpush3.bf16.msra.mxu1 %v403_v20 }
  0x37   :  { %405 = vmatprep.subr.bf16.mxu1 %v486_v0 }
  0x38   :  { %385 = vmatmul.mubr.msk.f32.vlgmr.msra.gmra.mrb[2].mxu0 %vm71_vm1, %v40_v16 }
  0x3a   :  { %407 = vmatpush3.bf16.msra.mxu1 %v406_v23 }
  0x3b   :  { %408 = vmatprep.subr.bf16.mxu1 %v486_v0 }
  0x3e   :  { %410 = vmatpush3.bf16.msra.mxu1 %v409_v26 }
  0x3f   :  { %411 = vmatprep.subr.bf16.mxu1 %v486_v0 }
  0x42   :  { %413 = vmatpush3.bf16.msra.mxu1 %v412_v34 }
  0x43   :  { %414 = vmatprep.subr.bf16.mxu1 %v486_v0 }
  0x46   :  { %416 = vmatpush3.bf16.msra.mxu1 %v415_v38 }
 0x103   :  { %v141_v40 = vpop.f32.mrb[0].mxu0 }
 0x104   :  { %v142_v41 = vadd.f32 %v299_v39, %v141_v40  ;;  %v340_v42 = vpop.f32.mrb[1].mxu0 }
 0x106   :  { %430 = vtanh.f32 %v142_v41 }
 0x10b   :  { %v282_v44 = vpop.f32.mrb[2].mxu0 }
 0x10c   :  { %v386_v45 = vpop.f32.mrb[3].mxu0 }
 0x110   :  { %v431_v43 = vpop.eup %430 }
 0x111   :  { %374 = vmatmul.mubr.f32.vlgmr.msra.gmra.mrb[0].mxu1 %v431_v43 }
 0x1e4   :  { %v212_v47 = vpop.f32.mrb[0].mxu1 }
 0x1e5   :  { %v283_v48 = vadd.f32 %v282_v44, %v212_v47  ;;  %v375_v49 = vpop.f32.mrb[1].mxu1 }
 0x1e7   :  { %v290_v50 = vadd.f32 %v302_v46, %v283_v48 }
 0x1e9   :  { %432 = vtanh.f32 %v290_v50 }
 0x1f3   :  { %v433_v51 = vpop.eup %432 }
 0x1f4   :  { %292 = vst [vmem:[%s569_s3] sm:$0xff] %v433_v51 }
 0x1f5   :  { %297 = vsyncpa [#allocation3], 1 }
 0x1f6   :  { %298 = vsyncpa [#allocation5], 1 }

</bundles_post_ra>
